<compile_context>
chip_gen: v7x
topology: tpu7x:2x2x1
jax: 0.10.0
libtpu: 0.0.40
codegen_flags: <defaults>
</compile_context>

<pallas_src>
import jax
import jax.numpy as jnp
from jax.experimental import pallas as pl
from jax.experimental.pallas import tpu as pltpu


def _round_up(x, m):
    return ((x + m - 1) // m) * m


def actor_net_kernel(x_ref, w1_ref, b1_ref, w2_ref, b2_ref, o_ref):
    # x: (TB, H); w1: (H, H2); b1: (1, H2); w2: (H2, P_pad); b2: (1, P_pad)
    x = x_ref[...]

    # Layer 1: Linear + ReLU (MXU matmul, f32 accumulation, bias/relu in f32).
    h = jnp.dot(x, w1_ref[...], preferred_element_type=jnp.float32)
    h = jnp.maximum(h + b1_ref[...].astype(jnp.float32), 0.0)

    # Layer 2: Linear (cast activations back to weight dtype for the MXU).
    h = h.astype(w2_ref.dtype)
    logits = jnp.dot(h, w2_ref[...], preferred_element_type=jnp.float32)
    logits = logits + b2_ref[...].astype(jnp.float32)

    # Numerically stable softmax over the (lane-padded) last dim, all in f32.
    # Padded lanes carry bias = -1e30 -> exp underflows to 0 -> zero prob.
    m = jnp.max(logits, axis=-1, keepdims=True)
    e = jnp.exp(logits - m)
    denom = jnp.sum(e, axis=-1, keepdims=True)
    probs = e * pl.reciprocal(denom, approx=False)
    o_ref[...] = probs.astype(o_ref.dtype)


def prepare_actor_params(w1, b1, w2, b2, *, lane_pad=128, compute_dtype=jnp.float32):
    """One-time parameter preparation (hoisted out of the hot path).

    w1: (H2, H) torch layout, b1: (H2,), w2: (P, H2), b2: (P,).
    Returns (w1_t, b1_2d, w2_t_padded, b2_2d_padded) where weights are stored
    as (in, out), the program dim is padded to a multiple of `lane_pad`, and
    padded bias lanes are -1e30 so softmax assigns them ~0 probability.
    """
    H2, H = w1.shape
    P = w2.shape[0]
    P_pad = _round_up(P, lane_pad)

    w1_t = jnp.asarray(w1).T.astype(compute_dtype)            # (H, H2)
    b1_2d = jnp.asarray(b1).reshape(1, H2).astype(jnp.float32)

    w2_t = jnp.zeros((H2, P_pad), compute_dtype)
    w2_t = w2_t.at[:, :P].set(jnp.asarray(w2).T.astype(compute_dtype))
    b2_2d = jnp.full((1, P_pad), -1e30, jnp.float32)
    b2_2d = b2_2d.at[0, :P].set(jnp.asarray(b2).astype(jnp.float32))
    return w1_t, b1_2d, w2_t, b2_2d


def actor_net_forward(hidden_state, params, num_programs, *, batch_tile=512,
                      vmem_limit_bytes=32 * 1024 * 1024):
    """hidden_state: (B, H). params: output of prepare_actor_params.
    Returns (B, num_programs) softmax probabilities (f32)."""
    w1_t, b1_2d, w2_t, b2_2d = params
    B, H = hidden_state.shape
    H2 = w1_t.shape[1]
    P_pad = w2_t.shape[1]
    compute_dtype = w1_t.dtype

    # Batch tile: multiple of 8 sublanes; big enough to pipeline well, small
    # enough to fit comfortably in v7x's (64 MiB physical / 32 MiB scoped) VMEM.
    TB = min(batch_tile, _round_up(B, 8))
    B_pad = _round_up(B, TB)

    x = hidden_state.astype(compute_dtype)
    if B_pad != B:
        x = jnp.pad(x, ((0, B_pad - B), (0, 0)))

    grid = (B_pad // TB,)

    itemsize = jnp.dtype(compute_dtype).itemsize
    cost = pl.CostEstimate(
        flops=2 * B_pad * H * H2 + 2 * B_pad * H2 * P_pad,
        transcendentals=B_pad * P_pad,
        bytes_accessed=(B_pad * H * itemsize
                        + H * H2 * itemsize + H2 * 4
                        + H2 * P_pad * itemsize + P_pad * 4
                        + B_pad * P_pad * 4),
    )

    out = pl.pallas_call(
        actor_net_kernel,
        out_shape=jax.ShapeDtypeStruct((B_pad, P_pad), jnp.float32),
        grid=grid,
        in_specs=[
            pl.BlockSpec((TB, H), lambda i: (i, 0)),       # activations stream
            pl.BlockSpec((H, H2), lambda i: (0, 0)),       # weights stay resident
            pl.BlockSpec((1, H2), lambda i: (0, 0)),
            pl.BlockSpec((H2, P_pad), lambda i: (0, 0)),
            pl.BlockSpec((1, P_pad), lambda i: (0, 0)),
        ],
        out_specs=pl.BlockSpec((TB, P_pad), lambda i: (i, 0)),
        compiler_params=pltpu.CompilerParams(
            dimension_semantics=("parallel",),
            vmem_limit_bytes=vmem_limit_bytes,
        ),
        cost_estimate=cost,
    )(x, w1_t, b1_2d, w2_t, b2_2d)

    return out[:B, :num_programs]


def _init_linear(key, out_features, in_features):
    """Deterministic init matching torch.nn.Linear default (uniform +-1/sqrt(fan_in))."""
    k_w, k_b = jax.random.split(key)
    bound = 1.0 / (in_features ** 0.5)
    w = jax.random.uniform(k_w, (out_features, in_features),
                           minval=-bound, maxval=bound, dtype=jnp.float32)
    b = jax.random.uniform(k_b, (out_features,),
                           minval=-bound, maxval=bound, dtype=jnp.float32)
    return w, b


def _reference(hidden_state, w1, b1, w2, b2):
    h = jnp.maximum(hidden_state @ w1.T + b1, 0.0)
    return jax.nn.softmax(h @ w2.T + b2, axis=-1)


if __name__ == "__main__":
    hidden_size = 32
    num_programs = 8
    batch = 2

    key = jax.random.PRNGKey(0)
    k_x, k_l1, k_l2 = jax.random.split(key, 3)

    hidden_state = jax.random.normal(k_x, (batch, hidden_size), dtype=jnp.float32)
    w1, b1 = _init_linear(k_l1, hidden_size // 2, hidden_size)   # l1: H -> H//2
    w2, b2 = _init_linear(k_l2, num_programs, hidden_size // 2)  # l2: H//2 -> P

    # One-time param prep (transpose + lane padding) — NOT in the per-call path.
    # For v6e/v7x large-batch serving, pass compute_dtype=jnp.bfloat16 here.
    params = prepare_actor_params(w1, b1, w2, b2, compute_dtype=jnp.float32)

    fwd = jax.jit(lambda x, p: actor_net_forward(x, p, num_programs))

    # Small-batch call (matches the original module's shapes).
    out = jax.block_until_ready(fwd(hidden_state, params))
    ref = _reference(hidden_state, w1, b1, w2, b2)
    assert out.shape == (batch, num_programs)
    assert jnp.allclose(out, ref, atol=1e-5, rtol=1e-5)
    assert jnp.allclose(jnp.sum(out, axis=-1), 1.0, atol=1e-5)

    # Batched path: many env-steps stacked into one call exercises the grid,
    # batch padding, and resident-weight pipelining.
    big_b = 1027  # deliberately ragged
    big_x = jax.random.normal(jax.random.PRNGKey(1), (big_b, hidden_size), jnp.float32)
    big_out = jax.block_until_ready(fwd(big_x, params))
    big_ref = _reference(big_x, w1, b1, w2, b2)
    assert big_out.shape == (big_b, num_programs)
    assert jnp.allclose(big_out, big_ref, atol=1e-5, rtol=1e-5)
    assert jnp.allclose(jnp.sum(big_out, axis=-1), 1.0, atol=1e-5)

    print("KERNEL_OK")
</pallas_src>

<mosaic_0001>
module attributes {stable_mosaic.version = 11 : i64} {
  func.func @actor_net_kernel(%arg0: i32, %arg1: memref<8x32xf32, #tpu.memory_space<vmem>>, %arg2: memref<32x16xf32, #tpu.memory_space<vmem>>, %arg3: memref<1x16xf32, #tpu.memory_space<vmem>>, %arg4: memref<16x128xf32, #tpu.memory_space<vmem>>, %arg5: memref<1x128xf32, #tpu.memory_space<vmem>>, %arg6: memref<8x128xf32, #tpu.memory_space<vmem>>) attributes {dimension_semantics = [#tpu.dimension_semantics<parallel>], iteration_bounds = array<i64: 1>, scalar_prefetch = 0 : i64, scratch_operands = 0 : i64, tpu.core_type = #tpu.core_type<tc>, window_params = [{transform_indices = @transform_0, window_bounds = array<i64: 8, 32>}, {pipeline_mode = #tpu.pipeline_mode<synchronous>, transform_indices = @transform_1, window_bounds = array<i64: 32, 16>}, {pipeline_mode = #tpu.pipeline_mode<synchronous>, transform_indices = @transform_2, window_bounds = array<i64: 1, 16>}, {pipeline_mode = #tpu.pipeline_mode<synchronous>, transform_indices = @transform_3, window_bounds = array<i64: 16, 128>}, {pipeline_mode = #tpu.pipeline_mode<synchronous>, transform_indices = @transform_4, window_bounds = array<i64: 1, 128>}, {transform_indices = @transform_5, window_bounds = array<i64: 8, 128>}]} {
    %c0 = arith.constant 0 : index
    %c0_0 = arith.constant 0 : index
    %0 = vector.load %arg1[%c0, %c0_0] : memref<8x32xf32, #tpu.memory_space<vmem>>, vector<8x32xf32>
    %c0_1 = arith.constant 0 : index
    %c0_2 = arith.constant 0 : index
    %1 = vector.load %arg2[%c0_1, %c0_2] : memref<32x16xf32, #tpu.memory_space<vmem>>, vector<32x16xf32>
    %cst = arith.constant dense<0.000000e+00> : vector<8x16xf32>
    %2 = tpu.matmul %0, %1, %cst {dimension_numbers = #tpu.dot_dimension_numbers<[1], [0], [0], [1], [0, 0, 1, 1], [], []>} : vector<8x32xf32>, vector<32x16xf32>, vector<8x16xf32> -> vector<8x16xf32>
    %c0_3 = arith.constant 0 : index
    %c0_4 = arith.constant 0 : index
    %3 = vector.load %arg3[%c0_3, %c0_4] : memref<1x16xf32, #tpu.memory_space<vmem>>, vector<1x16xf32>
    %4 = vector.broadcast %3 : vector<1x16xf32> to vector<8x16xf32>
    %5 = arith.addf %2, %4 : vector<8x16xf32>
    %cst_5 = arith.constant 0.000000e+00 : f32
    %6 = vector.broadcast %cst_5 : f32 to vector<8x16xf32>
    %7 = arith.maximumf %5, %6 : vector<8x16xf32>
    %c0_6 = arith.constant 0 : index
    %c0_7 = arith.constant 0 : index
    %8 = vector.load %arg4[%c0_6, %c0_7] : memref<16x128xf32, #tpu.memory_space<vmem>>, vector<16x128xf32>
    %cst_8 = arith.constant dense<0.000000e+00> : vector<8x128xf32>
    %9 = tpu.matmul %7, %8, %cst_8 {dimension_numbers = #tpu.dot_dimension_numbers<[1], [0], [0], [1], [0, 0, 1, 1], [], []>} : vector<8x16xf32>, vector<16x128xf32>, vector<8x128xf32> -> vector<8x128xf32>
    %c0_9 = arith.constant 0 : index
    %c0_10 = arith.constant 0 : index
    %10 = vector.load %arg5[%c0_9, %c0_10] : memref<1x128xf32, #tpu.memory_space<vmem>>, vector<1x128xf32>
    %11 = vector.broadcast %10 : vector<1x128xf32> to vector<8x128xf32>
    %12 = arith.addf %9, %11 : vector<8x128xf32>
    %cst_11 = arith.constant dense<0xFF800000> : vector<8xf32>
    %13 = vector.multi_reduction <maximumf>, %12, %cst_11 [1] : vector<8x128xf32> to vector<8xf32>
    %14 = vector.shape_cast %13 : vector<8xf32> to vector<8x1xf32>
    %15 = vector.broadcast %14 : vector<8x1xf32> to vector<8x128xf32>
    %16 = arith.subf %12, %15 : vector<8x128xf32>
    %17 = math.exp %16 : vector<8x128xf32>
    %cst_12 = arith.constant dense<0.000000e+00> : vector<8xf32>
    %18 = vector.multi_reduction <add>, %17, %cst_12 [1] : vector<8x128xf32> to vector<8xf32>
    %19 = vector.shape_cast %18 : vector<8xf32> to vector<8x1xf32>
    %20 = tpu.reciprocal %19 : vector<8x1xf32> -> vector<8x1xf32>
    %21 = vector.broadcast %20 : vector<8x1xf32> to vector<8x128xf32>
    %22 = arith.mulf %17, %21 : vector<8x128xf32>
    %c0_13 = arith.constant 0 : index
    %c0_14 = arith.constant 0 : index
    %23 = vector.load %arg6[%c0_13, %c0_14] : memref<8x128xf32, #tpu.memory_space<vmem>>, vector<8x128xf32>
    tpu.vector_store %arg6[%c0_13, %c0_14], %22 {strides = array<i32>} : memref<8x128xf32, #tpu.memory_space<vmem>>, vector<8x128xf32>,
    return
  }
  func.func @transform_0(%arg0: i32) -> (i32, i32) {
    %c0_i32 = arith.constant 0 : i32
    %c0_i32_0 = arith.constant 0 : i32
    return %arg0, %c0_i32 : i32, i32
  }
  func.func @transform_1(%arg0: i32) -> (i32, i32) {
    %c0_i32 = arith.constant 0 : i32
    %c0_i32_0 = arith.constant 0 : i32
    %c0_i32_1 = arith.constant 0 : i32
    return %c0_i32, %c0_i32_0 : i32, i32
  }
  func.func @transform_2(%arg0: i32) -> (i32, i32) {
    %c0_i32 = arith.constant 0 : i32
    %c0_i32_0 = arith.constant 0 : i32
    %c0_i32_1 = arith.constant 0 : i32
    return %c0_i32, %c0_i32_0 : i32, i32
  }
  func.func @transform_3(%arg0: i32) -> (i32, i32) {
    %c0_i32 = arith.constant 0 : i32
    %c0_i32_0 = arith.constant 0 : i32
    %c0_i32_1 = arith.constant 0 : i32
    return %c0_i32, %c0_i32_0 : i32, i32
  }
  func.func @transform_4(%arg0: i32) -> (i32, i32) {
    %c0_i32 = arith.constant 0 : i32
    %c0_i32_0 = arith.constant 0 : i32
    %c0_i32_1 = arith.constant 0 : i32
    return %c0_i32, %c0_i32_0 : i32, i32
  }
  func.func @transform_5(%arg0: i32) -> (i32, i32) {
    %c0_i32 = arith.constant 0 : i32
    %c0_i32_0 = arith.constant 0 : i32
    return %arg0, %c0_i32 : i32, i32
  }
}

</mosaic_0001>

<bundles_post_ra>
// kernel: _lambda_.1
= control target key start
LH: loop header
LB: loop body
LE: loop exit
PB: predicated region body
PF: predicated region fallthrough
CT: control target
= control target key end

     0   :  { %v250_v0 = vmov 0.0|0.0   ;;  %vm251_vm0 = vmmov 0   ;;  %v252_v4 = vmov 0.0   ;;  %vm32_vm1 = vcmask 261120   ;;  %s313_s1 = inlined_call_operand.vmem [shape: f32[32,16], index: 1, kind: input, shape index: {}]   ;;  %s314_s0 = inlined_call_operand.vmem [shape: f32[8,32], index: 0, kind: input, shape index: {}]   ;;  %s315_s3 = inlined_call_operand.vmem [shape: f32[16,128], index: 3, kind: input, shape index: {}]   ;;  %s316_s2 = inlined_call_operand.vmem [shape: f32[1,16], index: 2, kind: input, shape index: {}]   ;;  %s317_s4 = inlined_call_operand.vmem [shape: f32[1,128], index: 4, kind: input, shape index: {}]   ;;  %s318_s5 = inlined_call_operand.vmem [shape: f32[8,128], index: 5, kind: output, shape index: {}]  }
   0x1   :  { %234 = vmatprep.subr.bf16.mxu0 %v250_v0  ;;  %v21_v1 = vld [vmem:[%s313_s1] sm:$0xff]  ;;  %v22_v2 = vld [vmem:[%s313_s1 + $0x8] sm:$0xff]  ;;  %v23_v3 = vld [vmem:[%s313_s1 + $0x10] sm:$0xff]  ;;  %224 = vmatprep.mubr.msk.f32.mxu0 %vm251_vm0, %v252_v4  ;;  %vm116_vm2 = vcmask 130048  }
   0x2   :  { %v235_v5 = vpack.c.bf16 %v22_v2, %v21_v1  ;;  %v24_v6 = vld [vmem:[%s313_s1 + $0x18] sm:$0xff]  ;;  %240 = vmatprep.subr.bf16.mxu1 %v250_v0  ;;  %231 = vmatprep.mubr.msk.f32.mxu1 %vm251_vm0, %v252_v4  ;;  %v20_v8 = vld [vmem:[%s314_s0] sm:$0xff]  ;;  %v108_v10 = vld [vmem:[%s315_s3 + $0x8] sm:$0xff] }
   0x3   :  { %v238_v7 = vpack.c.bf16 %v24_v6, %v23_v3  ;;  %v107_v9 = vld [vmem:[%s315_s3] sm:$0xff] }
   0x4   :  { %236 = vmatpush3.bf16.msra.mxu0 %v235_v5  ;;  %v241_v11 = vpack.c.bf16 %v108_v10, %v107_v9  ;;  %v204_v12 = vld [vmem:[%s316_s2] ss:$0 sm:$0xff] }
   0x5   :  { %237 = vmatprep.subr.bf16.mxu0 %v250_v0  ;;  %v206_v17 = vld [vmem:[%s317_s4] ss:$0 sm:$0xff] }
   0x6   :  { %242 = vmatpush3.bf16.msra.mxu1 %v241_v11 }
   0x8   :  { %239 = vmatpush3.bf16.msra.mxu0 %v238_v7 }
   0xb   :  { %225 = vmatmul.mubr.msk.f32.vlgmr.msra.gmra.mrb[0].mxu0 %vm32_vm1, %v20_v8 }
  0xde   :  { %v102_v13 = vpop.f32.mrb[0].mxu0 }
  0xdf   :  { %v103_v14 = vadd.f32 %v204_v12, %v102_v13  ;;  %v226_v15 = vpop.f32.mrb[1].mxu0 }
  0xe1   :  { %v106_v16 = vmax.f32 %v103_v14, 0.0 }
  0xe3   :  { %232 = vmatmul.mubr.msk.f32.vlgmr.msra.gmra.mrb[0].mxu1 %vm116_vm2, %v106_v16 }
 0x1b6   :  { %v186_v18 = vpop.f32.mrb[0].mxu1 }
 0x1b7   :  { %v187_v19 = vadd.f32 %v206_v17, %v186_v18  ;;  %v233_v20 = vpop.f32.mrb[1].mxu1 }
 0x1b9   :  { %190 = vmax.xlane.f32.xlu0 %v187_v19 }
 0x246   :  { %v191_v21 = vpop.xlane.xlu0 %190 }
 0x247   :  { %v192_v22 = vsub.f32 %v187_v19, %v191_v21 }
 0x249   :  { %v193_v23 = vmul.f32 1.442695, %v192_v22 }
 0x24b   :  { %246 = vpow2.f32 %v193_v23 }
 0x255   :  { %v247_v24 = vpop.eup %246 }
 0x256   :  { %195 = vadd.xlane.f32.xlu0 %v247_v24 }
 0x2e3   :  { %v196_v25 = vpop.xlane.xlu0 %195 }
 0x2e4   :  { %248 = vrcp.f32 %v196_v25 }
 0x2ee   :  { %v249_v26 = vpop.eup %248 }
 0x2ef   :  { %v198_v27 = vmul.f32 %v249_v26, %v247_v24 }
 0x2f1   :  { %199 = vst [vmem:[%s318_s5] sm:$0xff] %v198_v27 }

</bundles_post_ra>
